<compile_context>
chip_gen: v7x
topology: tpu7x:2x2x1
jax: 0.10.0
libtpu: 0.0.40
codegen_flags: <defaults>
</compile_context>

<pallas_src>
import jax
import jax.numpy as jnp
from jax.experimental import pallas as pl
from jax.experimental.pallas import tpu as pltpu


# ---------------------------------------------------------------------------
# Kernels
# ---------------------------------------------------------------------------

def _denoiser_scalar_alpha_kernel(scal_ref, x_ref, w1x_ref, w1a_ref, b1_ref,
                                  w2_ref, b2_ref, w3_ref, o_ref):
    """3-layer MLP on one (1, TILE_N) lane-major batch tile; alpha is a scalar."""
    alpha = scal_ref[0]                            # SMEM f32[2] = [alpha, b3]
    b3 = scal_ref[1]
    x_row = x_ref[...]                             # (1, TN) -- batch on lanes

    # Layer 1 on the VPU as a broadcast FMA (avoids concat + K=2 MXU matmul):
    #   h1[w, n] = relu(W1[w, 0] * x[n] + W1[w, 1] * alpha + b1[w])
    bias1 = alpha * w1a_ref[...] + b1_ref[...]                 # (W, 1)
    h1 = jnp.maximum(w1x_ref[...] * x_row + bias1, 0.0)        # (W, TN)

    # Layer 2 on the MXU: (W, W) @ (W, TN) -> (W, TN), f32 accumulate.
    h2 = jnp.dot(w2_ref[...], h1, preferred_element_type=jnp.float32)
    h2 = jnp.maximum(h2 + b2_ref[...], 0.0)                    # (W, TN)

    # Layer 3: lane-dense (1, W) @ (W, TN) -> (1, TN).
    out = jnp.dot(w3_ref[...], h2, preferred_element_type=jnp.float32)
    o_ref[...] = out + b3                                      # (1, TN)


def _denoiser_vector_alpha_kernel(b3_ref, x_ref, a_ref, w1x_ref, w1a_ref,
                                  b1_ref, w2_ref, b2_ref, w3_ref, o_ref):
    """Same MLP, but alpha is a per-lane row (fused multi-timestep path)."""
    b3 = b3_ref[0]                                 # SMEM f32[1]
    x_row = x_ref[...]                             # (1, TN)
    a_row = a_ref[...]                             # (1, TN)

    h1 = jnp.maximum(
        w1x_ref[...] * x_row + w1a_ref[...] * a_row + b1_ref[...], 0.0)  # (W, TN)
    h2 = jnp.dot(w2_ref[...], h1, preferred_element_type=jnp.float32)
    h2 = jnp.maximum(h2 + b2_ref[...], 0.0)
    out = jnp.dot(w3_ref[...], h2, preferred_element_type=jnp.float32)
    o_ref[...] = out + b3


# ---------------------------------------------------------------------------
# Tiling helpers
# ---------------------------------------------------------------------------

def _num_tensorcores():
    """Best-effort TensorCore count per chip (2 on v7x, 1 on v5e/v6e)."""
    try:
        info = pltpu.get_tpu_info()
        for attr in ("num_cores", "tensorcores_per_chip", "num_tensorcores"):
            v = getattr(info, attr, None)
            if isinstance(v, int) and v > 0:
                return v
    except Exception:
        pass
    try:
        v = getattr(jax.devices()[0], "num_cores", None)
        if isinstance(v, int) and v > 0:
            return v
    except Exception:
        pass
    return 1


def _choose_tiling(n, max_tile=4096):
    """Return (tile, n_pad): fewest grid steps (>= #TensorCores), tile % 128 == 0."""
    cores = _num_tensorcores()
    n128 = pl.cdiv(n, 128) * 128
    steps = max(cores, pl.cdiv(n128, max_tile))
    tile = pl.cdiv(n128 // 128, steps) * 128
    return tile, steps * tile


def _divisor_tile(n_pad, max_tile=4096):
    """Largest multiple of 128 dividing n_pad, <= ceil(n_pad / cores), <= max_tile."""
    cores = _num_tensorcores()
    limit = min(max_tile, pl.cdiv(n_pad, cores * 128) * 128, n_pad)
    best = 128
    t = 128
    while t <= limit:
        if n_pad % t == 0:
            best = t
        t += 128
    return best


def _prep_weights(params):
    """Split / reshape PyTorch-layout weights for the lane-major kernels."""
    width = params["w1"].shape[0]
    w1 = params["w1"]                              # (W, 2) torch layout
    return (w1[:, 0:1],                            # w1x: column multiplying x
            w1[:, 1:2],                            # w1a: column multiplying alpha
            params["b1"].reshape(width, 1),
            params["w2"],                          # (W, W)
            params["b2"].reshape(width, 1),
            params["w3"])                          # (1, W)


def _resident(shape):
    # Full block, same block index every grid step -> stays resident in VMEM.
    return pl.BlockSpec(shape, lambda i: (0, 0))


_SMEM = pl.BlockSpec(memory_space=pltpu.MemorySpace.SMEM)


# ---------------------------------------------------------------------------
# Forward passes
# ---------------------------------------------------------------------------

def denoiser_forward_lane_major(x_row, alpha, params, *, tile=None):
    """Hot-loop entry point.

    x_row: (1, n_pad) f32, batch on the lane axis, n_pad a multiple of 128.
    Returns (1, n_pad) predictions in the same layout (no pad/slice copies).
    """
    n_pad = x_row.shape[1]
    assert n_pad % 128 == 0, "lane-major input must be padded to 128 lanes"
    if tile is None:
        tile = _divisor_tile(n_pad)
    assert n_pad % tile == 0

    w1x, w1a, b1, w2, b2, w3 = _prep_weights(params)
    width = w2.shape[0]

    # alpha and b3 merged into a single tiny 1-D SMEM array.
    scal = jnp.stack([jnp.asarray(alpha, jnp.float32).reshape(()),
                      jnp.asarray(params["b3"], jnp.float32).reshape(())])

    return pl.pallas_call(
        _denoiser_scalar_alpha_kernel,
        out_shape=jax.ShapeDtypeStruct((1, n_pad), jnp.float32),
        grid=(n_pad // tile,),
        in_specs=[
            _SMEM,                                       # [alpha, b3] scalar path
            pl.BlockSpec((1, tile), lambda i: (0, i)),   # x tile (lane-dense)
            _resident((width, 1)),                       # w1x
            _resident((width, 1)),                       # w1a
            _resident((width, 1)),                       # b1
            _resident((width, width)),                   # w2
            _resident((width, 1)),                       # b2
            _resident((1, width)),                       # w3
        ],
        out_specs=pl.BlockSpec((1, tile), lambda i: (0, i)),
        compiler_params=pltpu.CompilerParams(
            dimension_semantics=("parallel",)),
    )(scal, x_row, w1x, w1a, b1, w2, b2, w3)


def denoiser_forward(x, alpha, params):
    """PyTorch-signature wrapper: x (N, 1) f32, alpha scalar -> (N, 1) f32."""
    n = x.shape[0]
    tile, n_pad = _choose_tiling(n)

    # Batch goes on the lane axis: (N, 1) -> (1, N_pad), zero-padded.
    # (Hot loops should call denoiser_forward_lane_major directly instead.)
    x_row = jnp.zeros((1, n_pad), jnp.float32).at[0, :n].set(x[:, 0])
    out_row = denoiser_forward_lane_major(x_row, alpha, params, tile=tile)
    return out_row[0, :n].reshape(n, 1)


def denoiser_forward_timesteps(xs, alphas, params):
    """Fused multi-timestep forward: xs (T, N, 1), alphas (T,) -> (T, N, 1).

    All T evaluations are stacked along the lane axis and run in ONE
    pallas_call, with alpha carried as a per-lane vector.
    """
    t_steps, n, _ = xs.shape
    total = t_steps * n
    tile, n_pad = _choose_tiling(total)

    x_flat = xs.reshape(total).astype(jnp.float32)
    a_flat = jnp.repeat(alphas.astype(jnp.float32), n)

    x_row = jnp.zeros((1, n_pad), jnp.float32).at[0, :total].set(x_flat)
    a_row = jnp.zeros((1, n_pad), jnp.float32).at[0, :total].set(a_flat)

    w1x, w1a, b1, w2, b2, w3 = _prep_weights(params)
    width = w2.shape[0]
    b3 = jnp.asarray(params["b3"], jnp.float32).reshape(1)

    out_row = pl.pallas_call(
        _denoiser_vector_alpha_kernel,
        out_shape=jax.ShapeDtypeStruct((1, n_pad), jnp.float32),
        grid=(n_pad // tile,),
        in_specs=[
            _SMEM,                                       # b3 scalar path
            pl.BlockSpec((1, tile), lambda i: (0, i)),   # x tile
            pl.BlockSpec((1, tile), lambda i: (0, i)),   # alpha tile (per-lane)
            _resident((width, 1)),                       # w1x
            _resident((width, 1)),                       # w1a
            _resident((width, 1)),                       # b1
            _resident((width, width)),                   # w2
            _resident((width, 1)),                       # b2
            _resident((1, width)),                       # w3
        ],
        out_specs=pl.BlockSpec((1, tile), lambda i: (0, i)),
        compiler_params=pltpu.CompilerParams(
            dimension_semantics=("parallel",)),
    )(b3, x_row, a_row, w1x, w1a, b1, w2, b2, w3)

    return out_row[0, :total].reshape(t_steps, n, 1)


# ---------------------------------------------------------------------------
# Reference + init
# ---------------------------------------------------------------------------

def init_params(key, width):
    """PyTorch nn.Linear default init, U[-1/sqrt(fan_in), 1/sqrt(fan_in)]."""
    ks = jax.random.split(key, 6)

    def lin(kw, kb, fan_in, fan_out):
        bound = 1.0 / jnp.sqrt(jnp.float32(fan_in))
        # PyTorch layout: weight is (out_features, in_features).
        w = jax.random.uniform(kw, (fan_out, fan_in), jnp.float32, -bound, bound)
        b = jax.random.uniform(kb, (fan_out,), jnp.float32, -bound, bound)
        return w, b

    w1, b1 = lin(ks[0], ks[1], 2, width)
    w2, b2 = lin(ks[2], ks[3], width, width)
    w3, b3 = lin(ks[4], ks[5], width, 1)
    return {"w1": w1, "b1": b1, "w2": w2, "b2": b2, "w3": w3, "b3": b3}


def denoiser_ref(x, alpha, params):
    """Pure-JAX reference matching the PyTorch forward."""
    s = jnp.full((x.shape[0], 1), alpha, jnp.float32)
    xin = jnp.concatenate([x, s], axis=1)
    h1 = jnp.maximum(xin @ params["w1"].T + params["b1"], 0.0)
    h2 = jnp.maximum(h1 @ params["w2"].T + params["b2"], 0.0)
    return h2 @ params["w3"].T + params["b3"]


# ---------------------------------------------------------------------------
# Demo / self-test
# ---------------------------------------------------------------------------

if __name__ == "__main__":
    key = jax.random.PRNGKey(0)
    k_param, k_x, k_xs = jax.random.split(key, 3)

    width = 32
    batch = 2000   # matches test_size in the original script

    params = init_params(k_param, width)

    # Build x the same way the script does: noised scalar data of shape (N, 1).
    noise_scales = jnp.array(
        [0.001, 0.01, 0.05, 0.1, 0.2, 0.3, 0.4, 0.6, 0.8, 0.999], jnp.float32)
    alpha_bar = jnp.prod(1.0 - noise_scales)
    x = (jax.random.normal(k_x, (batch, 1), jnp.float32)
         * jnp.sqrt(1.0 - alpha_bar) + jnp.sqrt(alpha_bar))

    alpha = jnp.float32(0.3)   # example noise level passed to forward()

    # --- single-alpha forward (PyTorch-equivalent path) ---
    out = denoiser_forward(x, alpha, params)
    out = jax.block_until_ready(out)
    ref = denoiser_ref(x, alpha, params)
    assert out.shape == (batch, 1)
    assert jnp.allclose(out, ref, atol=1e-4, rtol=1e-5), (
        float(jnp.max(jnp.abs(out - ref))))

    # --- fused multi-timestep forward (one pallas_call for T timesteps) ---
    t_steps = 4
    xs = (jax.random.normal(k_xs, (t_steps, batch, 1), jnp.float32)
          * jnp.sqrt(1.0 - alpha_bar) + jnp.sqrt(alpha_bar))
    alphas = noise_scales[:t_steps]
    outs = denoiser_forward_timesteps(xs, alphas, params)
    outs = jax.block_until_ready(outs)
    refs = jnp.stack([denoiser_ref(xs[t], alphas[t], params)
                      for t in range(t_steps)])
    assert outs.shape == (t_steps, batch, 1)
    assert jnp.allclose(outs, refs, atol=1e-4, rtol=1e-5), (
        float(jnp.max(jnp.abs(outs - refs))))

    print("KERNEL_OK")
</pallas_src>

<mosaic_0001>
module attributes {stable_mosaic.version = 11 : i64} {
  func.func @_denoiser_scalar_alpha_kernel(%arg0: i32, %arg1: memref<2xf32, #tpu.memory_space<smem>>, %arg2: memref<1x2048xf32, #tpu.memory_space<vmem>>, %arg3: memref<32x1xf32, #tpu.memory_space<vmem>>, %arg4: memref<32x1xf32, #tpu.memory_space<vmem>>, %arg5: memref<32x1xf32, #tpu.memory_space<vmem>>, %arg6: memref<32x32xf32, #tpu.memory_space<vmem>>, %arg7: memref<32x1xf32, #tpu.memory_space<vmem>>, %arg8: memref<1x32xf32, #tpu.memory_space<vmem>>, %arg9: memref<1x2048xf32, #tpu.memory_space<vmem>>) attributes {dimension_semantics = [#tpu.dimension_semantics<parallel>], iteration_bounds = array<i64: 1>, scalar_prefetch = 0 : i64, scratch_operands = 0 : i64, tpu.core_type = #tpu.core_type<tc>, window_params = [{transform_indices = @transform_0, window_bounds = array<i64: 2>}, {transform_indices = @transform_1, window_bounds = array<i64: 1, 2048>}, {pipeline_mode = #tpu.pipeline_mode<synchronous>, transform_indices = @transform_2, window_bounds = array<i64: 32, 1>}, {pipeline_mode = #tpu.pipeline_mode<synchronous>, transform_indices = @transform_3, window_bounds = array<i64: 32, 1>}, {pipeline_mode = #tpu.pipeline_mode<synchronous>, transform_indices = @transform_4, window_bounds = array<i64: 32, 1>}, {pipeline_mode = #tpu.pipeline_mode<synchronous>, transform_indices = @transform_5, window_bounds = array<i64: 32, 32>}, {pipeline_mode = #tpu.pipeline_mode<synchronous>, transform_indices = @transform_6, window_bounds = array<i64: 32, 1>}, {pipeline_mode = #tpu.pipeline_mode<synchronous>, transform_indices = @transform_7, window_bounds = array<i64: 1, 32>}, {transform_indices = @transform_8, window_bounds = array<i64: 1, 2048>}]} {
    %c0 = arith.constant 0 : index
    %0 = memref.load %arg1[%c0] : memref<2xf32, #tpu.memory_space<smem>>
    %c1 = arith.constant 1 : index
    %1 = memref.load %arg1[%c1] : memref<2xf32, #tpu.memory_space<smem>>
    %c0_0 = arith.constant 0 : index
    %c0_1 = arith.constant 0 : index
    %2 = vector.load %arg2[%c0_0, %c0_1] : memref<1x2048xf32, #tpu.memory_space<vmem>>, vector<1x2048xf32>
    %c0_2 = arith.constant 0 : index
    %c0_3 = arith.constant 0 : index
    %3 = vector.load %arg4[%c0_2, %c0_3] : memref<32x1xf32, #tpu.memory_space<vmem>>, vector<32x1xf32>
    %4 = vector.broadcast %0 : f32 to vector<32x1xf32>
    %5 = arith.mulf %4, %3 : vector<32x1xf32>
    %c0_4 = arith.constant 0 : index
    %c0_5 = arith.constant 0 : index
    %6 = vector.load %arg5[%c0_4, %c0_5] : memref<32x1xf32, #tpu.memory_space<vmem>>, vector<32x1xf32>
    %7 = arith.addf %5, %6 : vector<32x1xf32>
    %c0_6 = arith.constant 0 : index
    %c0_7 = arith.constant 0 : index
    %8 = vector.load %arg3[%c0_6, %c0_7] : memref<32x1xf32, #tpu.memory_space<vmem>>, vector<32x1xf32>
    %9 = vector.broadcast %8 : vector<32x1xf32> to vector<32x2048xf32>
    %10 = vector.broadcast %2 : vector<1x2048xf32> to vector<32x2048xf32>
    %11 = arith.mulf %9, %10 : vector<32x2048xf32>
    %12 = vector.broadcast %7 : vector<32x1xf32> to vector<32x2048xf32>
    %13 = arith.addf %11, %12 : vector<32x2048xf32>
    %cst = arith.constant 0.000000e+00 : f32
    %14 = vector.broadcast %cst : f32 to vector<32x2048xf32>
    %15 = arith.maximumf %13, %14 : vector<32x2048xf32>
    %c0_8 = arith.constant 0 : index
    %c0_9 = arith.constant 0 : index
    %16 = vector.load %arg6[%c0_8, %c0_9] : memref<32x32xf32, #tpu.memory_space<vmem>>, vector<32x32xf32>
    %cst_10 = arith.constant dense<0.000000e+00> : vector<32x2048xf32>
    %17 = tpu.matmul %16, %15, %cst_10 {dimension_numbers = #tpu.dot_dimension_numbers<[1], [0], [0], [1], [0, 0, 1, 1], [], []>} : vector<32x32xf32>, vector<32x2048xf32>, vector<32x2048xf32> -> vector<32x2048xf32>
    %c0_11 = arith.constant 0 : index
    %c0_12 = arith.constant 0 : index
    %18 = vector.load %arg7[%c0_11, %c0_12] : memref<32x1xf32, #tpu.memory_space<vmem>>, vector<32x1xf32>
    %19 = vector.broadcast %18 : vector<32x1xf32> to vector<32x2048xf32>
    %20 = arith.addf %17, %19 : vector<32x2048xf32>
    %cst_13 = arith.constant 0.000000e+00 : f32
    %21 = vector.broadcast %cst_13 : f32 to vector<32x2048xf32>
    %22 = arith.maximumf %20, %21 : vector<32x2048xf32>
    %c0_14 = arith.constant 0 : index
    %c0_15 = arith.constant 0 : index
    %23 = vector.load %arg8[%c0_14, %c0_15] : memref<1x32xf32, #tpu.memory_space<vmem>>, vector<1x32xf32>
    %cst_16 = arith.constant dense<0.000000e+00> : vector<1x2048xf32>
    %24 = tpu.matmul %23, %22, %cst_16 {dimension_numbers = #tpu.dot_dimension_numbers<[1], [0], [0], [1], [0, 0, 1, 1], [], []>} : vector<1x32xf32>, vector<32x2048xf32>, vector<1x2048xf32> -> vector<1x2048xf32>
    %25 = vector.broadcast %1 : f32 to vector<1x2048xf32>
    %26 = arith.addf %24, %25 : vector<1x2048xf32>
    %c0_17 = arith.constant 0 : index
    %c0_18 = arith.constant 0 : index
    %27 = vector.load %arg9[%c0_17, %c0_18] : memref<1x2048xf32, #tpu.memory_space<vmem>>, vector<1x2048xf32>
    tpu.vector_store %arg9[%c0_17, %c0_18], %26 {strides = array<i32>} : memref<1x2048xf32, #tpu.memory_space<vmem>>, vector<1x2048xf32>,
    return
  }
  func.func @transform_0(%arg0: i32) -> i32 {
    %c0_i32 = arith.constant 0 : i32
    %c0_i32_0 = arith.constant 0 : i32
    return %c0_i32 : i32
  }
  func.func @transform_1(%arg0: i32) -> (i32, i32) {
    %c0_i32 = arith.constant 0 : i32
    %c0_i32_0 = arith.constant 0 : i32
    return %c0_i32, %arg0 : i32, i32
  }
  func.func @transform_2(%arg0: i32) -> (i32, i32) {
    %c0_i32 = arith.constant 0 : i32
    %c0_i32_0 = arith.constant 0 : i32
    %c0_i32_1 = arith.constant 0 : i32
    return %c0_i32, %c0_i32_0 : i32, i32
  }
  func.func @transform_3(%arg0: i32) -> (i32, i32) {
    %c0_i32 = arith.constant 0 : i32
    %c0_i32_0 = arith.constant 0 : i32
    %c0_i32_1 = arith.constant 0 : i32
    return %c0_i32, %c0_i32_0 : i32, i32
  }
  func.func @transform_4(%arg0: i32) -> (i32, i32) {
    %c0_i32 = arith.constant 0 : i32
    %c0_i32_0 = arith.constant 0 : i32
    %c0_i32_1 = arith.constant 0 : i32
    return %c0_i32, %c0_i32_0 : i32, i32
  }
  func.func @transform_5(%arg0: i32) -> (i32, i32) {
    %c0_i32 = arith.constant 0 : i32
    %c0_i32_0 = arith.constant 0 : i32
    %c0_i32_1 = arith.constant 0 : i32
    return %c0_i32, %c0_i32_0 : i32, i32
  }
  func.func @transform_6(%arg0: i32) -> (i32, i32) {
    %c0_i32 = arith.constant 0 : i32
    %c0_i32_0 = arith.constant 0 : i32
    %c0_i32_1 = arith.constant 0 : i32
    return %c0_i32, %c0_i32_0 : i32, i32
  }
  func.func @transform_7(%arg0: i32) -> (i32, i32) {
    %c0_i32 = arith.constant 0 : i32
    %c0_i32_0 = arith.constant 0 : i32
    %c0_i32_1 = arith.constant 0 : i32
    return %c0_i32, %c0_i32_0 : i32, i32
  }
  func.func @transform_8(%arg0: i32) -> (i32, i32) {
    %c0_i32 = arith.constant 0 : i32
    %c0_i32_0 = arith.constant 0 : i32
    return %c0_i32, %arg0 : i32, i32
  }
}

</mosaic_0001>

<bundles_post_ra>
// kernel: tpu_custom_call.1
= control target key start
LH: loop header
LB: loop body
LE: loop exit
PB: predicated region body
PF: predicated region fallthrough
CT: control target
= control target key end

     0   :  { %13 = vsyncpa [#allocation4], 0  ;;  %s2750_s0 = inlined_call_operand.vmem [shape: f32[2], index: 0, kind: input, shape index: {}]   ;;  %s2751_s1 = inlined_call_operand.vmem [shape: f32[1,2048], index: 1, kind: input, shape index: {}]   ;;  %s2752_s2 = inlined_call_operand.vmem [shape: f32[32,1], index: 2, kind: input, shape index: {}]   ;;  %s2753_s3 = inlined_call_operand.vmem [shape: f32[32,1], index: 3, kind: input, shape index: {}]   ;;  %s2754_s4 = inlined_call_operand.vmem [shape: f32[32,1], index: 4, kind: input, shape index: {}]   ;;  %s2755_s5 = inlined_call_operand.vmem [shape: f32[32,32], index: 5, kind: input, shape index: {}]   ;;  %s2756_s6 = inlined_call_operand.vmem [shape: f32[32,1], index: 6, kind: input, shape index: {}]   ;;  %s2757_s7 = inlined_call_operand.vmem [shape: f32[1,32], index: 7, kind: input, shape index: {}]   ;;  %s2758_s8 = inlined_call_operand.hbm [shape: f32[1,2048], index: 8, kind: output, shape index: {}]  }
   0x1   :  { %14 = vsyncpa [#allocation3], 0  ;;  %s21_s29 = sshll.u32 %s2750_s0, 4  ;;  %s22_s29 = int_to_ptr.vmem [resolvable:$true] %s21_s29 }
   0x2   :  { %s2081_s30 = scalar_lea.vmem %s22_s29, 16  ;;  %p2086_p1 = scmp.lt.s32.totalorder %s22_s29, %s22_s29 }
   0x3   :  { %p2082_p0 = scmp.ne.s32.totalorder %s22_s29, %s2081_s30  ;;  %p2087_p2 = scmp.lt.s32.totalorder %s2081_s30, %s2081_s30 }
   0x5   :  { %p2088_p3 = por %p2087_p2, %p2086_p1 }
   0x7   :  { %p2089_p4 = pnand %p2088_p3, %p2082_p0 }
   0x9   :  { %2092 = shalt.err (!%p2089_p4)
}
   0xa   :  { %s2119_s9 = smov [#allocation2]  }
   0xb   :  { %24 = dma.vmem_to_smem %s22_s29, 16, %s2119_s9, [#allocation4]  }
   0xc   :  { %2115 = dma.done.wait [#allocation4], 16  }
   0xd   :  { %2116 = vsyncadd [#allocation4], 4294967280 }
   0xe   :  { %42 = sfence }
   0xf   :  { %v64_v0 = vld [vmem:[%s2752_s2] sm:$0xff]  ;;  %v67_v1 = vld [vmem:[%s2752_s2 + $0x18] sm:$0xff]  ;;  %s43_s0 = sld [smem:[#allocation2]]  ;;  %v2120_v2 = vmov 0   ;;  %v65_v3 = vld [vmem:[%s2752_s2 + $0x8] sm:$0xff]  ;;  %v2763_v26 = vmov 0.0   ;;  %v90_v27 = vlaneseq }
  0x10   :  { %2079 = vset.pattern.permute.xlu0 %v2120_v2  ;;  %2080 = vset.pattern.permute.xlu1 %v2120_v2  ;;  %v47_v4 = vld [vmem:[%s2753_s3] sm:$0xff]  ;;  %v49_v5 = vld [vmem:[%s2753_s3 + $0x10] sm:$0xff]  ;;  %v48_v6 = vld [vmem:[%s2753_s3 + $0x8] sm:$0xff]  ;;  %vm410_vm0 = vcmask 261120   ;;  %s2123_s27 = smov [#allocation5]  }
  0x11   :  { %70 = vperm.xlu0 %2079, %v64_v0   ;;  %85 = vperm.xlu1 %2080, %v67_v1   ;;  %v56_v8 = vld [vmem:[%s2754_s4] sm:$0xff]  ;;  %v66_v9 = vld [vmem:[%s2752_s2 + $0x10] sm:$0xff]  ;;  %v57_v14 = vld [vmem:[%s2754_s4 + $0x8] sm:$0xff]  ;;  %v2222_v28 = vshrl.u32 %v90_v27, 7  ;;  %s1896_s28 = sshll.u32 %s2123_s27, 4  ;;  %s1897_s28 = int_to_ptr.vmem [resolvable:$true] %s1896_s28 }
  0x12   :  { %v58_v12 = vld [vmem:[%s2754_s4 + $0x10] sm:$0xff]  ;;  %v50_v15 = vld [vmem:[%s2753_s3 + $0x18] sm:$0xff]  ;;  %v386_v21 = vld [vmem:[%s2756_s6] sm:$0xff]  ;;  %487 = vmatprep.mubr.f32.mxu0 %v2763_v26  ;;  %576 = vmatprep.mubr.f32.mxu1 %v2763_v26  ;;  %s2093_s29 = scalar_lea.vmem %s1897_s28, 256  ;;  %p2098_p6 = scmp.lt.s32.totalorder %s1897_s28, %s1897_s28 }
  0x13   :  { %v59_v20 = vld [vmem:[%s2754_s4 + $0x18] sm:$0xff]  ;;  %v388_v23 = vld [vmem:[%s2756_s6 + $0x10] sm:$0xff]  ;;  %v387_v24 = vld [vmem:[%s2756_s6 + $0x8] sm:$0xff]  ;;  %2773 = vst [vmem:[#allocation8_spill] sm:$0xff] %v2222_v28  ;;  %v96_v29 = vsub.s32 1, %v2222_v28  ;;  %v104_v30 = vsub.s32 3, %v2222_v28  ;;  %p2094_p5 = scmp.ne.s32.totalorder %s1897_s28, %s2093_s29  ;;  %p2099_p7 = scmp.lt.s32.totalorder %s2093_s29, %s2093_s29 }
  0x14   :  { %v389_v25 = vld [vmem:[%s2756_s6 + $0x18] sm:$0xff]  ;;  %v45_v31 = vld [vmem:[%s2751_s1] sm:$0xff]  ;;  %v92_v32 = vsub.s32 0, %v2222_v28  ;;  %v100_v33 = vsub.s32 2, %v2222_v28  ;;  %v2762_v34 = vsub.s32 5, %v2222_v28  ;;  %v2761_v35 = vsub.s32 7, %v2222_v28 }
  0x15   :  { %75 = vperm.xlu0 %2079, %v65_v3   ;;  %v51_v7 = vstv %s43_s0  ;;  %v2760_v36 = vsub.s32 4, %v2222_v28  ;;  %v2759_v37 = vsub.s32 6, %v2222_v28  ;;  %v97_v38 = vrot.slane %v45_v31, %v96_v29  ;;  %v2238_v40 = vld [vmem:[%s2751_s1 + $0x8] sm:$0xff]  ;;  %p2100_p8 = por %p2099_p7, %p2098_p6 }
  0x16   :  { %v52_v10 = vmul.f32 %v51_v7, %v47_v4  ;;  %v54_v11 = vmul.f32 %v51_v7, %v49_v5  ;;  %v53_v13 = vmul.f32 %v51_v7, %v48_v6  ;;  %v55_v19 = vmul.f32 %v51_v7, %v50_v15  ;;  %2774 = vst [vmem:[#allocation9_spill] sm:$0xff] %v2238_v40 }
  0x17   :  { %v105_v39 = vrot.slane %v45_v31, %v104_v30  ;;  %v93_v41 = vrot.slane %v45_v31, %v92_v32  ;;  %v101_v42 = vrot.slane %v45_v31, %v100_v33  ;;  %v2242_v43 = vrot.slane %v45_v31, %v2762_v34  ;;  %p2101_p9 = pnand %p2100_p8, %p2094_p5 }
  0x18   :  { %v60_v16 = vadd.f32 %v56_v8, %v52_v10  ;;  %v62_v17 = vadd.f32 %v58_v12, %v54_v11  ;;  %v61_v18 = vadd.f32 %v57_v14, %v53_v13  ;;  %v63_v22 = vadd.f32 %v59_v20, %v55_v19 }
  0x19   :  { %80 = vperm.xlu0 %2079, %v66_v9   ;;  %v2246_v44 = vrot.slane %v45_v31, %v2761_v35  ;;  %v2253_v47 = vrot.slane %v2238_v40, %v92_v32  ;;  %v2256_v48 = vrot.slane %v2238_v40, %v100_v33  ;;  %v2260_v49 = vrot.slane %v45_v31, %v2760_v36 }
  0x1a   :  { %236 = vperm.xlu1 %2080, %v60_v16   ;;  %v2264_v50 = vrot.slane %v45_v31, %v2759_v37  ;;  %v2269_v53 = vrot.slane %v2238_v40, %v96_v29  ;;  %v2272_v54 = vrot.slane %v2238_v40, %v104_v30 }
  0x1b   :  { %2775 = vst [vmem:[#allocation10_spill] sm:$0xff] %v2253_v47 }
  0x1c   :  { %2776 = vst [vmem:[#allocation11_spill] sm:$0xff] %v2272_v54 }
  0x1d   :  { %246 = vperm.xlu0 %2079, %v62_v17  }
  0x1e   :  { %241 = vperm.xlu1 %2080, %v61_v18  }
  0x21   :  { %392 = vperm.xlu0 %2079, %v386_v21  }
  0x22   :  { %251 = vperm.xlu1 %2080, %v63_v22  }
  0x25   :  { %402 = vperm.xlu0 %2079, %v388_v23  }
  0x26   :  { %397 = vperm.xlu1 %2080, %v387_v24  }
  0x2a   :  { %407 = vperm.xlu1 %2080, %v389_v25  }
  0x90   :  { %v2248_v45 = vpop.permute.xlu0 %70  ;;  %v2250_v46 = vpop.permute.xlu1 %85 }
  0x91   :  { %v171_v51 = vmul.f32 %v97_v38, %v2248_v45  ;;  %v173_v52 = vmul.f32 %v105_v39, %v2248_v45  ;;  %v170_v55 = vmul.f32 %v93_v41, %v2248_v45  ;;  %v172_v56 = vmul.f32 %v101_v42, %v2248_v45 }
  0x92   :  { %v2277_v57 = vmul.f32 %v97_v38, %v2250_v46  ;;  %v2280_v58 = vmul.f32 %v105_v39, %v2250_v46  ;;  %v2283_v59 = vmul.f32 %v93_v41, %v2250_v46  ;;  %v2286_v60 = vmul.f32 %v101_v42, %v2250_v46 }
  0x93   :  { %v175_v61 = vmul.f32 %v2242_v43, %v2248_v45  ;;  %v177_v62 = vmul.f32 %v2246_v44, %v2248_v45  ;;  %v174_v0 = vmul.f32 %v2260_v49, %v2248_v45  ;;  %v176_v1 = vmul.f32 %v2264_v50, %v2248_v45 }
  0x94   :  { %v2292_v63 = vpop.permute.xlu0 %75  ;;  %v2300_v2 = vmul.f32 %v2242_v43, %v2250_v46  ;;  %v2304_v3 = vmul.f32 %v2246_v44, %v2250_v46  ;;  %v2310_v6 = vmul.f32 %v2260_v49, %v2250_v46  ;;  %v2314_v7 = vmul.f32 %v2264_v50, %v2250_v46 }
  0x95   :  { %v187_v4 = vmul.f32 %v97_v38, %v2292_v63  ;;  %v189_v5 = vmul.f32 %v105_v39, %v2292_v63  ;;  %v186_v8 = vmul.f32 %v93_v41, %v2292_v63  ;;  %v188_v9 = vmul.f32 %v101_v42, %v2292_v63 }
  0x96   :  { %v191_v10 = vmul.f32 %v2242_v43, %v2292_v63  ;;  %v193_v11 = vmul.f32 %v2246_v44, %v2292_v63  ;;  %v190_v12 = vmul.f32 %v2260_v49, %v2292_v63  ;;  %v2326_v13 = vmul.f32 %v2264_v50, %v2292_v63 }
  0x97   :  { %v2330_v14 = vmul.f32 %v2269_v53, %v2248_v45  ;;  %v2334_v15 = vmul.f32 %v2269_v53, %v2292_v63  ;;  %v2340_v17 = vmul.f32 %v2272_v54, %v2248_v45  ;;  %v2344_v18 = vmul.f32 %v2272_v54, %v2292_v63 }
  0x98   :  { %v2336_v16 = vpop.permute.xlu0 %80  ;;  %v2348_v19 = vmul.f32 %v2253_v47, %v2248_v45  ;;  %v2352_v20 = vmul.f32 %v2253_v47, %v2292_v63 }
  0x99   :  { %v2354_v21 = vpop.permute.xlu1 %236  ;;  %v203_v22 = vmul.f32 %v97_v38, %v2336_v16  ;;  %v205_v23 = vmul.f32 %v105_v39, %v2336_v16  ;;  %v202_v24 = vmul.f32 %v93_v41, %v2336_v16  ;;  %v204_v25 = vmul.f32 %v101_v42, %v2336_v16 }
  0x9a   :  { %v255_v27 = vadd.f32 %v2354_v21, %v171_v51  ;;  %v257_v29 = vadd.f32 %v2354_v21, %v173_v52  ;;  %v254_v30 = vadd.f32 %v2354_v21, %v170_v55  ;;  %v256_v31 = vadd.f32 %v2354_v21, %v172_v56 }
  0x9b   :  { %v259_v32 = vadd.f32 %v2354_v21, %v175_v61  ;;  %v261_v33 = vadd.f32 %v2354_v21, %v177_v62  ;;  %v258_v38 = vadd.f32 %v2354_v21, %v174_v0  ;;  %v2368_v39 = vadd.f32 %v2354_v21, %v176_v1 }
  0x9c   :  { %v2370_v41 = vpop.permute.xlu0 %246  ;;  %v319_v42 = vmax.f32 %v255_v27, 0.0  ;;  %v321_v37 = vmax.f32 %v257_v29, 0.0  ;;  %v318_v51 = vmax.f32 %v254_v30, 0.0  ;;  %v320_v36 = vmax.f32 %v256_v31, 0.0 }
  0x9d   :  { %v2372_v52 = vpop.permute.xlu1 %241  ;;  %v287_v55 = vadd.f32 %v2370_v41, %v203_v22  ;;  %v289_v56 = vadd.f32 %v2370_v41, %v205_v23  ;;  %v286_v61 = vadd.f32 %v2370_v41, %v202_v24  ;;  %v288_v62 = vadd.f32 %v2370_v41, %v204_v25 }
  0x9e   :  { %v271_v0 = vadd.f32 %v2372_v52, %v187_v4  ;;  %v273_v1 = vadd.f32 %v2372_v52, %v189_v5  ;;  %v270_v35 = vadd.f32 %v2372_v52, %v186_v8  ;;  %v272_v27 = vadd.f32 %v2372_v52, %v188_v9 }
  0x9f   :  { %v351_v29 = vmax.f32 %v287_v55, 0.0  ;;  %v353_v30 = vmax.f32 %v289_v56, 0.0  ;;  %v350_v31 = vmax.f32 %v286_v61, 0.0  ;;  %v352_v34 = vmax.f32 %v288_v62, 0.0 }
  0xa0   :  { %v335_v26 = vmax.f32 %v271_v0, 0.0  ;;  %v337_v22 = vmax.f32 %v273_v1, 0.0  ;;  %v334_v47 = vmax.f32 %v270_v35, 0.0  ;;  %v336_v23 = vmax.f32 %v272_v27, 0.0 }
  0xa1   :  { %v2382_v40 = vpop.permute.xlu1 %251  ;;  %v275_v24 = vadd.f32 %v2372_v52, %v191_v10  ;;  %v323_v25 = vmax.f32 %v259_v32, 0.0  ;;  %v277_v4 = vadd.f32 %v2372_v52, %v193_v11  ;;  %v325_v5 = vmax.f32 %v261_v33, 0.0 }
  0xa2   :  { %v1946_v28 = vpack.c.bf16 %v335_v26, %v319_v42  ;;  %v1954_v8 = vpack.c.bf16 %v337_v22, %v321_v37  ;;  %v1948_v54 = vpack.c.bf16 %v334_v47, %v318_v51  ;;  %v1956_v9 = vpack.c.bf16 %v336_v23, %v320_v36 }
  0xa3   :  { %v303_v55 = vadd.f32 %v2382_v40, %v2277_v57  ;;  %v305_v56 = vadd.f32 %v2382_v40, %v2280_v58  ;;  %v302_v35 = vadd.f32 %v2382_v40, %v2283_v59  ;;  %v304_v10 = vadd.f32 %v2382_v40, %v2286_v60 }
  0xa4   :  { %1947 = vmatprep.subr.bf16.mxu0 %v1946_v28  ;;  %1955 = vmatprep.subr.bf16.mxu1 %v1954_v8  ;;  %v339_v11 = vmax.f32 %v275_v24, 0.0  ;;  %v341_v32 = vmax.f32 %v277_v4, 0.0  ;;  %v274_v26 = vadd.f32 %v2372_v52, %v190_v12  ;;  %v322_v37 = vmax.f32 %v258_v38, 0.0 }
  0xa5   :  { %1949 = vmatpush1.bf16.msra.mxu0 %v1948_v54  ;;  %1957 = vmatpush1.bf16.msra.mxu1 %v1956_v9  ;;  %v367_v36 = vmax.f32 %v303_v55, 0.0  ;;  %v369_v47 = vmax.f32 %v305_v56, 0.0  ;;  %v366_v57 = vmax.f32 %v302_v35, 0.0  ;;  %v368_v33 = vmax.f32 %v304_v10, 0.0 }
  0xa6   :  { %v1962_v58 = vpack.c.bf16 %v339_v11, %v323_v25  ;;  %v1970_v42 = vpack.c.bf16 %v341_v32, %v325_v5  ;;  %v338_v51 = vmax.f32 %v274_v26, 0.0  ;;  %v276_v59 = vadd.f32 %v2372_v52, %v2326_v13 }
  0xa7   :  { %v1950_v60 = vpack.c.bf16 %v367_v36, %v351_v29  ;;  %v1958_v28 = vpack.c.bf16 %v369_v47, %v353_v30  ;;  %v1952_v61 = vpack.c.bf16 %v366_v57, %v350_v31  ;;  %v1960_v62 = vpack.c.bf16 %v368_v33, %v352_v34  ;;  %v2409_v34 = vld [vmem:[%s2755_s5] sm:$0xff]  ;;  %v2455_v33 = vld [vmem:[%s2755_s5 + $0x10] sm:$0xff] }
  0xa8   :  { %v1964_v0 = vpack.c.bf16 %v338_v51, %v322_v37  ;;  %v324_v12 = vmax.f32 %v2368_v39, 0.0  ;;  %v340_v38 = vmax.f32 %v276_v59, 0.0  ;;  %v207_v54 = vmul.f32 %v2242_v43, %v2336_v16 }
  0xa9   :  { %1951 = vmatprep.subr.bf16.mxu0 %v1950_v60  ;;  %1959 = vmatprep.subr.bf16.mxu1 %v1958_v28  ;;  %v307_v1 = vadd.f32 %v2382_v40, %v2300_v2  ;;  %v209_v27 = vmul.f32 %v2246_v44, %v2336_v16  ;;  %v309_v13 = vadd.f32 %v2382_v40, %v2304_v3  ;;  %v2777_v56 = vmov 0.0  }
  0xaa   :  { %1953 = vmatpush1.bf16.msra.mxu0 %v1952_v61  ;;  %1961 = vmatpush1.bf16.msra.mxu1 %v1960_v62  ;;  %v1972_v43 = vpack.c.bf16 %v340_v38, %v324_v12  ;;  %v291_v39 = vadd.f32 %v2370_v41, %v207_v54  ;;  %v206_v2 = vmul.f32 %v2260_v49, %v2336_v16  ;;  %v2781_v38 = vld [vmem:[#allocation9_spill] sm:$0xff] }
  0xab   :  { %1963 = vmatprep.subr.bf16.mxu0 %v1962_v58  ;;  %1971 = vmatprep.subr.bf16.mxu1 %v1970_v42  ;;  %v371_v44 = vmax.f32 %v307_v1, 0.0  ;;  %v293_v29 = vadd.f32 %v2370_v41, %v209_v27  ;;  %v373_v3 = vmax.f32 %v309_v13, 0.0  ;;  %v306_v30 = vadd.f32 %v2382_v40, %v2310_v6 }
  0xac   :  { %v355_v31 = vmax.f32 %v291_v39, 0.0  ;;  %v290_v22 = vadd.f32 %v2370_v41, %v206_v2  ;;  %v208_v23 = vmul.f32 %v2264_v50, %v2336_v16  ;;  %v308_v24 = vadd.f32 %v2382_v40, %v2314_v7  ;;  %v2433_v7 = vld [vmem:[%s2755_s5 + $0x8] sm:$0xff] }
  0xad   :  { %1906 = vmatmul.mubr.msk.f32.vlgmr.msra.gmra.mrb[0].mxu0 %vm410_vm0, %v2409_v34  ;;  %1910 = vmatmul.mubr.msk.f32.vlgmr.msra.gmra.mrb[0].mxu1 %vm410_vm0, %v2409_v34  ;;  %v357_v49 = vmax.f32 %v293_v29, 0.0  ;;  %v370_v25 = vmax.f32 %v306_v30, 0.0  ;;  %v263_v6 = vadd.f32 %v2354_v21, %v2330_v14  ;;  %v279_v4 = vadd.f32 %v2372_v52, %v2334_v15 }
  0xae   :  { %1965 = vmatpush1.bf16.msra.mxu0 %v1964_v0  ;;  %1973 = vmatpush1.bf16.msra.mxu1 %v1972_v43  ;;  %v1966_v50 = vpack.c.bf16 %v371_v44, %v355_v31  ;;  %v354_v5 = vmax.f32 %v290_v22, 0.0  ;;  %v292_v8 = vadd.f32 %v2370_v41, %v208_v23  ;;  %v372_v9 = vmax.f32 %v308_v24, 0.0  ;;  %v2779_v0 = vld [vmem:[#allocation8_spill] sm:$0xff] }
  0xaf   :  { %v1974_v55 = vpack.c.bf16 %v373_v3, %v357_v49  ;;  %493 = vmatprep.mubr.f32.mxu0 %v2777_v56  ;;  %582 = vmatprep.mubr.f32.mxu1 %v2777_v56  ;;  %v327_v14 = vmax.f32 %v263_v6, 0.0  ;;  %v343_v35 = vmax.f32 %v279_v4, 0.0  ;;  %v265_v15 = vadd.f32 %v2354_v21, %v2340_v17  ;;  %v2783_v3 = vld [vmem:[#allocation10_spill] sm:$0xff] }
  0xb0   :  { %1967 = vmatprep.subr.bf16.mxu0 %v1966_v50  ;;  %v1968_v10 = vpack.c.bf16 %v370_v25, %v354_v5  ;;  %v356_v11 = vmax.f32 %v292_v8, 0.0  ;;  %v281_v32 = vadd.f32 %v2372_v52, %v2344_v18  ;;  %v180_v26 = vmul.f32 %v2256_v48, %v2248_v45 }
  0xb1   :  { %1975 = vmatprep.subr.bf16.mxu1 %v1974_v55  ;;  %1907 = vmatmul.mubr.msk.f32.gmra.mrb[2].mxu0 %vm410_vm0, %v2433_v7  ;;  %v1978_v37 = vpack.c.bf16 %v343_v35, %v327_v14  ;;  %v278_v36 = vadd.f32 %v2372_v52, %v2352_v20  ;;  %v196_v17 = vmul.f32 %v2256_v48, %v2292_v63  ;;  %v329_v18 = vmax.f32 %v265_v15, 0.0 }
  0xb2   :  { %1911 = vmatmul.mubr.msk.f32.gmra.mrb[2].mxu1 %vm410_vm0, %v2433_v7  ;;  %1969 = vmatpush1.bf16.msra.mxu0 %v1968_v10  ;;  %v1976_v47 = vpack.c.bf16 %v372_v9, %v356_v11  ;;  %v345_v57 = vmax.f32 %v281_v32, 0.0  ;;  %v262_v58 = vadd.f32 %v2354_v21, %v2348_v19  ;;  %v264_v20 = vadd.f32 %v2354_v21, %v180_v26  ;;  %v2778_v19 = vld [vmem:[#allocation11_spill] sm:$0xff] }
  0xb3   :  { %1979 = vmatprep.subr.bf16.mxu0 %v1978_v37  ;;  %499 = vmatprep.mubr.f32.mxu0 %v2777_v56  ;;  %v280_v42 = vadd.f32 %v2372_v52, %v196_v17  ;;  %v227_v51 = vmul.f32 %v2269_v53, %v2250_v46  ;;  %v342_v60 = vmax.f32 %v278_v36, 0.0  ;;  %v211_v28 = vmul.f32 %v2269_v53, %v2336_v16  ;;  %v2487_v53 = vld [vmem:[%s2755_s5 + $0x18] sm:$0xff] }
  0xb4   :  { %1977 = vmatpush1.bf16.msra.mxu1 %v1976_v47  ;;  %v1986_v59 = vpack.c.bf16 %v345_v57, %v329_v18  ;;  %588 = vmatprep.mubr.f32.mxu1 %v2777_v56  ;;  %v229_v61 = vmul.f32 %v2778_v19, %v2250_v46  ;;  %v2780_v12 = vsub.s32 5, %v2779_v0  ;;  %v2782_v1 = vsub.s32 7, %v2779_v0 }
  0xb5   :  { %1908 = vmatmul.mubr.msk.f32.gmra.mrb[4].mxu0 %vm410_vm0, %v2455_v33  ;;  %v311_v62 = vadd.f32 %v2382_v40, %v227_v51  ;;  %v326_v13 = vmax.f32 %v262_v58, 0.0  ;;  %v295_v43 = vadd.f32 %v2370_v41, %v211_v28  ;;  %v213_v39 = vmul.f32 %v2778_v19, %v2336_v16 }
  0xb6   :  { %v2475_v54 = vrot.slane %v2781_v38, %v2780_v12  ;;  %v2480_v27 = vrot.slane %v2781_v38, %v2782_v1  ;;  %1987 = vmatprep.subr.bf16.mxu1 %v1986_v59  ;;  %1912 = vmatmul.mubr.msk.f32.gmra.mrb[4].mxu1 %vm410_vm0, %v2455_v33  ;;  %v313_v2 = vadd.f32 %v2382_v40, %v229_v61  ;;  %v328_v44 = vmax.f32 %v264_v20, 0.0 }
  0xb7   :  { %505 = vmatprep.mubr.f32.mxu0 %v2777_v56  ;;  %594 = vmatprep.mubr.f32.mxu1 %v2777_v56  ;;  %v344_v29 = vmax.f32 %v280_v42, 0.0  ;;  %v226_v30 = vmul.f32 %v2783_v3, %v2250_v46  ;;  %v2784_v31 = vsub.s32 4, %v2779_v0  ;;  %v1980_v23 = vpack.c.bf16 %v342_v60, %v326_v13 }
  0xb8   :  { %v297_v24 = vadd.f32 %v2370_v41, %v213_v39  ;;  %v210_v49 = vmul.f32 %v2783_v3, %v2336_v16  ;;  %v228_v25 = vmul.f32 %v2256_v48, %v2250_v46  ;;  %v375_v6 = vmax.f32 %v311_v62, 0.0 }
  0xb9   :  { %v2500_v22 = vrot.slane %v2781_v38, %v2784_v31  ;;  %1909 = vmatmul.mubr.msk.f32.gmra.mrb[6].mxu0 %vm410_vm0, %v2487_v53  ;;  %v310_v4 = vadd.f32 %v2382_v40, %v226_v30  ;;  %v212_v50 = vmul.f32 %v2256_v48, %v2336_v16  ;;  %v183_v5 = vmul.f32 %v2475_v54, %v2248_v45 }
  0xba   :  { %1913 = vmatmul.mubr.msk.f32.gmra.mrb[6].mxu1 %vm410_vm0, %v2487_v53  ;;  %665 = vmatprep.mubr.f32.mxu0 %v2777_v56  ;;  %v359_v8 = vmax.f32 %v295_v43, 0.0  ;;  %v377_v9 = vmax.f32 %v313_v2, 0.0  ;;  %v294_v55 = vadd.f32 %v2370_v41, %v210_v49  ;;  %v312_v14 = vadd.f32 %v2382_v40, %v228_v25 }
  0xbb   :  { %754 = vmatprep.mubr.f32.mxu1 %v2777_v56  ;;  %v296_v35 = vadd.f32 %v2370_v41, %v212_v50  ;;  %v199_v48 = vmul.f32 %v2475_v54, %v2292_v63  ;;  %v267_v15 = vadd.f32 %v2354_v21, %v183_v5  ;;  %v185_v10 = vmul.f32 %v2480_v27, %v2248_v45 }
  0xbc   :  { %v1988_v11 = vpack.c.bf16 %v344_v29, %v328_v44  ;;  %v361_v32 = vmax.f32 %v297_v24, 0.0  ;;  %v374_v26 = vmax.f32 %v310_v4, 0.0  ;;  %v201_v37 = vmul.f32 %v2480_v27, %v2292_v63 }
  0xbd   :  { %1914 = vmatmul.mubr.msk.f32.vlgmr.msra.gmra.mrb[8].mxu0 %vm410_vm0, %v2409_v34  ;;  %v1982_v36 = vpack.c.bf16 %v375_v6, %v359_v8  ;;  %v376_v17 = vmax.f32 %v312_v14, 0.0  ;;  %v283_v47 = vadd.f32 %v2372_v52, %v199_v48  ;;  %v269_v18 = vadd.f32 %v2354_v21, %v185_v10 }
  0xbe   :  { %1918 = vmatmul.mubr.msk.f32.vlgmr.msra.gmra.mrb[8].mxu1 %vm410_vm0, %v2409_v34  ;;  %1981 = vmatpush1.bf16.msra.mxu0 %v1980_v23  ;;  %v1990_v57 = vpack.c.bf16 %v377_v9, %v361_v32  ;;  %v358_v58 = vmax.f32 %v294_v55, 0.0  ;;  %v285_v20 = vadd.f32 %v2372_v52, %v201_v37  ;;  %v360_v42 = vmax.f32 %v296_v35, 0.0 }
  0xbf   :  { %1989 = vmatpush1.bf16.msra.mxu1 %v1988_v11  ;;  %1983 = vmatprep.subr.bf16.mxu0 %v1982_v36  ;;  %v331_v51 = vmax.f32 %v267_v15, 0.0  ;;  %v347_v59 = vmax.f32 %v283_v47, 0.0  ;;  %v2785_v60 = vsub.s32 6, %v2779_v0  ;;  %v333_v61 = vmax.f32 %v269_v18, 0.0 }
  0xc0   :  { %1991 = vmatprep.subr.bf16.mxu1 %v1990_v57  ;;  %671 = vmatprep.mubr.f32.mxu0 %v2777_v56  ;;  %v1984_v19 = vpack.c.bf16 %v374_v26, %v358_v58  ;;  %v349_v62 = vmax.f32 %v285_v20, 0.0  ;;  %v1992_v12 = vpack.c.bf16 %v376_v17, %v360_v42  ;;  %v198_v13 = vmul.f32 %v2500_v22, %v2292_v63  ;;  %v2638_v57 = vpop.permute.xlu0 %392  ;;  %v2641_v58 = vpop.permute.xlu1 %397 }
  0xc1   :  { %v149_v28 = vrot.slane %v2781_v38, %v2785_v60  ;;  %760 = vmatprep.mubr.f32.mxu1 %v2777_v56  ;;  %1915 = vmatmul.mubr.msk.f32.gmra.mrb[10].mxu0 %vm410_vm0, %v2433_v7  ;;  %v1994_v1 = vpack.c.bf16 %v347_v59, %v331_v51  ;;  %v182_v43 = vmul.f32 %v2500_v22, %v2248_v45 }
  0xc2   :  { %1919 = vmatmul.mubr.msk.f32.gmra.mrb[10].mxu1 %vm410_vm0, %v2433_v7  ;;  %1985 = vmatpush1.bf16.msra.mxu0 %v1984_v19  ;;  %v2002_v38 = vpack.c.bf16 %v349_v62, %v333_v61  ;;  %v282_v39 = vadd.f32 %v2372_v52, %v198_v13  ;;  %v231_v44 = vmul.f32 %v2475_v54, %v2250_v46 }
  0xc3   :  { %1993 = vmatpush1.bf16.msra.mxu1 %v1992_v12  ;;  %1995 = vmatprep.subr.bf16.mxu0 %v1994_v1  ;;  %v200_v2 = vmul.f32 %v149_v28, %v2292_v63  ;;  %v266_v29 = vadd.f32 %v2354_v21, %v182_v43  ;;  %v184_v3 = vmul.f32 %v149_v28, %v2248_v45 }
  0xc4   :  { %2003 = vmatprep.subr.bf16.mxu1 %v2002_v38  ;;  %677 = vmatprep.mubr.f32.mxu0 %v2777_v56  ;;  %v233_v30 = vmul.f32 %v2480_v27, %v2250_v46  ;;  %v215_v31 = vmul.f32 %v2475_v54, %v2336_v16  ;;  %v315_v23 = vadd.f32 %v2382_v40, %v231_v44 }
  0xc5   :  { %766 = vmatprep.mubr.f32.mxu1 %v2777_v56  ;;  %1916 = vmatmul.mubr.msk.f32.gmra.mrb[12].mxu0 %vm410_vm0, %v2455_v33  ;;  %v284_v63 = vadd.f32 %v2372_v52, %v200_v2  ;;  %v217_v45 = vmul.f32 %v2480_v27, %v2336_v16  ;;  %v230_v49 = vmul.f32 %v2500_v22, %v2250_v46  ;;  %v346_v52 = vmax.f32 %v282_v39, 0.0 }
  0xc6   :  { %1920 = vmatmul.mubr.msk.f32.gmra.mrb[12].mxu1 %vm410_vm0, %v2455_v33  ;;  %683 = vmatprep.mubr.f32.mxu0 %v2777_v56  ;;  %v317_v24 = vadd.f32 %v2382_v40, %v233_v30  ;;  %v268_v54 = vadd.f32 %v2354_v21, %v184_v3  ;;  %v299_v25 = vadd.f32 %v2370_v41, %v215_v31  ;;  %v379_v8 = vmax.f32 %v315_v23, 0.0  ;;  %v2650_v23 = vpop.permute.xlu0 %402 }
  0xc7   :  { %772 = vmatprep.mubr.f32.mxu1 %v2777_v56  ;;  %v301_v6 = vadd.f32 %v2370_v41, %v217_v45  ;;  %v214_v4 = vmul.f32 %v2500_v22, %v2336_v16  ;;  %v314_v50 = vadd.f32 %v2382_v40, %v230_v49  ;;  %v232_v27 = vmul.f32 %v149_v28, %v2250_v46 }
  0xc8   :  { %v348_v5 = vmax.f32 %v284_v63, 0.0  ;;  %v216_v9 = vmul.f32 %v149_v28, %v2336_v16  ;;  %v330_v21 = vmax.f32 %v266_v29, 0.0  ;;  %v381_v55 = vmax.f32 %v317_v24, 0.0 }
  0xc9   :  { %1917 = vmatmul.mubr.msk.f32.gmra.mrb[14].mxu0 %vm410_vm0, %v2487_v53  ;;  %v298_v22 = vadd.f32 %v2370_v41, %v214_v4  ;;  %v316_v14 = vadd.f32 %v2382_v40, %v232_v27  ;;  %v332_v46 = vmax.f32 %v268_v54, 0.0  ;;  %v363_v35 = vmax.f32 %v299_v25, 0.0  ;;  %v2653_v25 = vpop.permute.xlu1 %407 }
  0xca   :  { %1921 = vmatmul.mubr.msk.f32.gmra.mrb[14].mxu1 %vm410_vm0, %v2487_v53  ;;  %843 = vmatprep.mubr.f32.mxu0 %v2777_v56  ;;  %v300_v48 = vadd.f32 %v2370_v41, %v216_v9  ;;  %v1996_v15 = vpack.c.bf16 %v346_v52, %v330_v21  ;;  %v365_v10 = vmax.f32 %v301_v6, 0.0  ;;  %v378_v16 = vmax.f32 %v314_v50, 0.0 }
  0xcb   :  { %932 = vmatprep.mubr.f32.mxu1 %v2777_v56  ;;  %v2004_v11 = vpack.c.bf16 %v348_v5, %v332_v46  ;;  %v1998_v32 = vpack.c.bf16 %v379_v8, %v363_v35  ;;  %v380_v26 = vmax.f32 %v316_v14, 0.0  ;;  %v362_v37 = vmax.f32 %v298_v22, 0.0 }
  0xcc   :  { %v2006_v40 = vpack.c.bf16 %v381_v55, %v365_v10  ;;  %v364_v36 = vmax.f32 %v300_v48, 0.0 }
  0xcd   :  { %1922 = vmatmul.mubr.msk.f32.vlgmr.msra.gmra.mrb[16].mxu0 %vm410_vm0, %v2409_v34  ;;  %v2000_v41 = vpack.c.bf16 %v378_v16, %v362_v37 }
  0xce   :  { %1926 = vmatmul.mubr.msk.f32.vlgmr.msra.gmra.mrb[16].mxu1 %vm410_vm0, %v2409_v34  ;;  %1997 = vmatpush1.bf16.msra.mxu0 %v1996_v15  ;;  %v2008_v17 = vpack.c.bf16 %v380_v26, %v364_v36 }
  0xcf   :  { %2005 = vmatpush1.bf16.msra.mxu1 %v2004_v11  ;;  %1999 = vmatprep.subr.bf16.mxu0 %v1998_v32 }
  0xd0   :  { %2007 = vmatprep.subr.bf16.mxu1 %v2006_v40  ;;  %849 = vmatprep.mubr.f32.mxu0 %v2777_v56 }
  0xd1   :  { %938 = vmatprep.mubr.f32.mxu1 %v2777_v56  ;;  %1923 = vmatmul.mubr.msk.f32.gmra.mrb[18].mxu0 %vm410_vm0, %v2433_v7 }
  0xd2   :  { %1927 = vmatmul.mubr.msk.f32.gmra.mrb[18].mxu1 %vm410_vm0, %v2433_v7  ;;  %2001 = vmatpush1.bf16.msra.mxu0 %v2000_v41 }
  0xd3   :  { %2009 = vmatpush1.bf16.msra.mxu1 %v2008_v17  ;;  %855 = vmatprep.mubr.f32.mxu0 %v2777_v56 }
  0xd4   :  { %944 = vmatprep.mubr.f32.mxu1 %v2777_v56 }
  0xd5   :  { %1924 = vmatmul.mubr.msk.f32.gmra.mrb[20].mxu0 %vm410_vm0, %v2455_v33 }
  0xd6   :  { %1928 = vmatmul.mubr.msk.f32.gmra.mrb[20].mxu1 %vm410_vm0, %v2455_v33  ;;  %861 = vmatprep.mubr.f32.mxu0 %v2777_v56 }
  0xd7   :  { %950 = vmatprep.mubr.f32.mxu1 %v2777_v56 }
  0xd9   :  { %1925 = vmatmul.mubr.msk.f32.gmra.mrb[22].mxu0 %vm410_vm0, %v2487_v53 }
  0xda   :  { %1929 = vmatmul.mubr.msk.f32.gmra.mrb[22].mxu1 %vm410_vm0, %v2487_v53  ;;  %1021 = vmatprep.mubr.f32.mxu0 %v2777_v56 }
  0xdb   :  { %1110 = vmatprep.mubr.f32.mxu1 %v2777_v56 }
  0xdd   :  { %1930 = vmatmul.mubr.msk.f32.vlgmr.msra.gmra.mrb[24].mxu0 %vm410_vm0, %v2409_v34 }
  0xde   :  { %1934 = vmatmul.mubr.msk.f32.vlgmr.msra.gmra.mrb[24].mxu1 %vm410_vm0, %v2409_v34  ;;  %1027 = vmatprep.mubr.f32.mxu0 %v2777_v56 }
  0xdf   :  { %1116 = vmatprep.mubr.f32.mxu1 %v2777_v56 }
  0xe1   :  { %1931 = vmatmul.mubr.msk.f32.gmra.mrb[26].mxu0 %vm410_vm0, %v2433_v7 }
  0xe2   :  { %1935 = vmatmul.mubr.msk.f32.gmra.mrb[26].mxu1 %vm410_vm0, %v2433_v7  ;;  %1033 = vmatprep.mubr.f32.mxu0 %v2777_v56 }
  0xe3   :  { %1122 = vmatprep.mubr.f32.mxu1 %v2777_v56 }
  0xe5   :  { %1932 = vmatmul.mubr.msk.f32.gmra.mrb[28].mxu0 %vm410_vm0, %v2455_v33 }
  0xe6   :  { %1936 = vmatmul.mubr.msk.f32.gmra.mrb[28].mxu1 %vm410_vm0, %v2455_v33  ;;  %1039 = vmatprep.mubr.f32.mxu0 %v2777_v56 }
  0xe7   :  { %1128 = vmatprep.mubr.f32.mxu1 %v2777_v56 }
  0xe9   :  { %1933 = vmatmul.mubr.msk.f32.gmra.mrb[30].mxu0 %vm410_vm0, %v2487_v53 }
  0xea   :  { %1937 = vmatmul.mubr.msk.f32.gmra.mrb[30].mxu1 %vm410_vm0, %v2487_v53  ;;  %1268 = vmatprep.mubr.f32.mxu0 %v2777_v56 }
  0xeb   :  { %1339 = vmatprep.mubr.f32.mxu1 %v2777_v56 }
 0x180   :  { %v489_v34 = vpop.f32.mrb[0].mxu0  ;;  %v578_v7 = vpop.f32.mrb[0].mxu1 }
 0x181   :  { %v491_v47 = vpop.f32.mrb[1].mxu0  ;;  %v580_v18 = vpop.f32.mrb[1].mxu1  ;;  %v490_v33 = vadd.f32 %v489_v34, %v2638_v57  ;;  %v579_v20 = vadd.f32 %v578_v7, %v2638_v57 }
 0x182   :  { %v492_v42 = vadd.f32 %v491_v47, %v2638_v57  ;;  %v581_v53 = vadd.f32 %v580_v18, %v2638_v57 }
 0x183   :  { %v1135_v12 = vmax.f32 %v490_v33, 0.0  ;;  %v1137_v38 = vmax.f32 %v579_v20, 0.0 }
 0x184   :  { %v495_v51 = vpop.f32.mrb[2].mxu0  ;;  %v1136_v43 = vmax.f32 %v492_v42, 0.0  ;;  %v1138_v29 = vmax.f32 %v581_v53, 0.0 }
 0x185   :  { %v496_v59 = vadd.f32 %v495_v51, %v2641_v58  ;;  %v584_v60 = vpop.f32.mrb[2].mxu1  ;;  %v497_v28 = vpop.f32.mrb[3].mxu0 }
 0x186   :  { %v585_v19 = vadd.f32 %v584_v60, %v2641_v58  ;;  %v498_v61 = vadd.f32 %v497_v28, %v2641_v58  ;;  %v586_v62 = vpop.f32.mrb[3].mxu1  ;;  %v2670_v60 = vld [vmem:[%s2757_s7] sm:$0x1]  ;;  %s1905_s7 = sld [smem:[#allocation2 + $0x1]] }
 0x187   :  { %v1151_v1 = vmax.f32 %v496_v59, 0.0  ;;  %v587_v13 = vadd.f32 %v586_v62, %v2641_v58 }
 0x188   :  { %v1153_v39 = vmax.f32 %v585_v19, 0.0  ;;  %v1152_v2 = vmax.f32 %v498_v61, 0.0  ;;  %v501_v44 = vpop.f32.mrb[4].mxu0 }
 0x189   :  { %v2012_v3 = vpack.c.bf16 %v1151_v1, %v1135_v12  ;;  %v1154_v30 = vmax.f32 %v587_v13, 0.0  ;;  %v590_v63 = vpop.f32.mrb[4].mxu1  ;;  %v503_v31 = vpop.f32.mrb[5].mxu0  ;;  %v502_v54 = vadd.f32 %v501_v44, %v2650_v23 }
 0x18a   :  { %v2020_v45 = vpack.c.bf16 %v1153_v39, %v1137_v38  ;;  %v2010_v24 = vpack.c.bf16 %v1152_v2, %v1136_v43  ;;  %v592_v49 = vpop.f32.mrb[5].mxu1  ;;  %v591_v6 = vadd.f32 %v590_v63, %v2650_v23  ;;  %v504_v4 = vadd.f32 %v503_v31, %v2650_v23 }
 0x18b   :  { %v2018_v52 = vpack.c.bf16 %v1154_v30, %v1138_v29  ;;  %v593_v27 = vadd.f32 %v592_v49, %v2650_v23  ;;  %v1167_v14 = vmax.f32 %v502_v54, 0.0 }
 0x18c   :  { %v507_v50 = vpop.f32.mrb[6].mxu0  ;;  %2011 = vmatprep.subr.bf16.mxu0 %v2010_v24  ;;  %v1169_v48 = vmax.f32 %v591_v6, 0.0  ;;  %v1168_v15 = vmax.f32 %v504_v4, 0.0 }
 0x18d   :  { %v508_v5 = vadd.f32 %v507_v50, %v2653_v25  ;;  %v596_v8 = vpop.f32.mrb[6].mxu1  ;;  %2019 = vmatprep.subr.bf16.mxu1 %v2018_v52  ;;  %v509_v9 = vpop.f32.mrb[7].mxu0  ;;  %2013 = vmatpush1.bf16.msra.mxu0 %v2012_v3  ;;  %v1170_v32 = vmax.f32 %v593_v27, 0.0 }
 0x18e   :  { %v597_v21 = vadd.f32 %v596_v8, %v2653_v25  ;;  %v510_v55 = vadd.f32 %v509_v9, %v2653_v25  ;;  %v598_v22 = vpop.f32.mrb[7].mxu1  ;;  %2021 = vmatpush1.bf16.msra.mxu1 %v2020_v45 }
 0x18f   :  { %v1183_v46 = vmax.f32 %v508_v5, 0.0  ;;  %v599_v35 = vadd.f32 %v598_v22, %v2653_v25 }
 0x190   :  { %v1185_v10 = vmax.f32 %v597_v21, 0.0  ;;  %v1184_v16 = vmax.f32 %v510_v55, 0.0  ;;  %v667_v11 = vpop.f32.mrb[8].mxu0 }
 0x191   :  { %v2016_v26 = vpack.c.bf16 %v1183_v46, %v1167_v14  ;;  %v1186_v40 = vmax.f32 %v599_v35, 0.0  ;;  %v756_v37 = vpop.f32.mrb[8].mxu1  ;;  %v669_v36 = vpop.f32.mrb[9].mxu0  ;;  %v668_v47 = vadd.f32 %v667_v11, %v2638_v57 }
 0x192   :  { %v2024_v41 = vpack.c.bf16 %v1185_v10, %v1169_v48  ;;  %v2014_v17 = vpack.c.bf16 %v1184_v16, %v1168_v15  ;;  %v758_v34 = vpop.f32.mrb[9].mxu1  ;;  %v757_v18 = vadd.f32 %v756_v37, %v2638_v57  ;;  %v670_v33 = vadd.f32 %v669_v36, %v2638_v57 }
 0x193   :  { %v2022_v7 = vpack.c.bf16 %v1186_v40, %v1170_v32  ;;  %v759_v42 = vadd.f32 %v758_v34, %v2638_v57  ;;  %v1139_v62 = vmax.f32 %v668_v47, 0.0 }
 0x194   :  { %v673_v20 = vpop.f32.mrb[10].mxu0  ;;  %2015 = vmatprep.subr.bf16.mxu0 %v2014_v17  ;;  %v1141_v13 = vmax.f32 %v757_v18, 0.0  ;;  %v1140_v38 = vmax.f32 %v670_v33, 0.0 }
 0x195   :  { %v674_v51 = vadd.f32 %v673_v20, %v2641_v58  ;;  %v762_v53 = vpop.f32.mrb[10].mxu1  ;;  %2023 = vmatprep.subr.bf16.mxu1 %v2022_v7  ;;  %v675_v59 = vpop.f32.mrb[11].mxu0  ;;  %2017 = vmatpush1.bf16.msra.mxu0 %v2016_v26  ;;  %v1142_v44 = vmax.f32 %v759_v42, 0.0 }
 0x196   :  { %v763_v28 = vadd.f32 %v762_v53, %v2641_v58  ;;  %v676_v19 = vadd.f32 %v675_v59, %v2641_v58  ;;  %v764_v61 = vpop.f32.mrb[11].mxu1  ;;  %2025 = vmatpush1.bf16.msra.mxu1 %v2024_v41 }
 0x197   :  { %v1155_v12 = vmax.f32 %v674_v51, 0.0  ;;  %v765_v1 = vadd.f32 %v764_v61, %v2641_v58 }
 0x198   :  { %v1157_v43 = vmax.f32 %v763_v28, 0.0  ;;  %v1156_v39 = vmax.f32 %v676_v19, 0.0  ;;  %v679_v2 = vpop.f32.mrb[12].mxu0  ;;  %1938 = vmatmul.mubr.msk.f32.vlgmr.msra.gmra.mrb[32].mxu0 %vm410_vm0, %v2670_v60 }
 0x199   :  { %v2028_v29 = vpack.c.bf16 %v1155_v12, %v1139_v62  ;;  %v1158_v3 = vmax.f32 %v765_v1, 0.0  ;;  %v768_v30 = vpop.f32.mrb[12].mxu1  ;;  %v681_v63 = vpop.f32.mrb[13].mxu0  ;;  %1939 = vmatmul.mubr.msk.f32.vlgmr.msra.gmra.mrb[32].mxu1 %vm410_vm0, %v2670_v60  ;;  %1410 = vmatprep.mubr.f32.mxu0 %v2777_v56  ;;  %v680_v52 = vadd.f32 %v679_v2, %v2650_v23 }
 0x19a   :  { %v2036_v31 = vpack.c.bf16 %v1157_v43, %v1141_v13  ;;  %v2026_v45 = vpack.c.bf16 %v1156_v39, %v1140_v38  ;;  %v770_v24 = vpop.f32.mrb[13].mxu1  ;;  %1481 = vmatprep.mubr.f32.mxu1 %v2777_v56  ;;  %v769_v54 = vadd.f32 %v768_v30, %v2650_v23  ;;  %v682_v6 = vadd.f32 %v681_v63, %v2650_v23 }
 0x19b   :  { %v2034_v49 = vpack.c.bf16 %v1158_v3, %v1142_v44  ;;  %v771_v50 = vadd.f32 %v770_v24, %v2650_v23  ;;  %v1171_v22 = vmax.f32 %v680_v52, 0.0 }
 0x19c   :  { %v685_v4 = vpop.f32.mrb[14].mxu0  ;;  %2027 = vmatprep.subr.bf16.mxu0 %v2026_v45  ;;  %v1173_v35 = vmax.f32 %v769_v54, 0.0  ;;  %v1172_v48 = vmax.f32 %v682_v6, 0.0 }
 0x19d   :  { %v686_v27 = vadd.f32 %v685_v4, %v2653_v25  ;;  %v774_v5 = vpop.f32.mrb[14].mxu1  ;;  %2035 = vmatprep.subr.bf16.mxu1 %v2034_v49  ;;  %v687_v8 = vpop.f32.mrb[15].mxu0  ;;  %2029 = vmatpush1.bf16.msra.mxu0 %v2028_v29  ;;  %v1174_v11 = vmax.f32 %v771_v50, 0.0 }
 0x19e   :  { %v775_v9 = vadd.f32 %v774_v5, %v2653_v25  ;;  %v688_v21 = vadd.f32 %v687_v8, %v2653_v25  ;;  %v776_v55 = vpop.f32.mrb[15].mxu1  ;;  %2037 = vmatpush1.bf16.msra.mxu1 %v2036_v31 }
 0x19f   :  { %v1187_v14 = vmax.f32 %v686_v27, 0.0  ;;  %v777_v46 = vadd.f32 %v776_v55, %v2653_v25 }
 0x1a0   :  { %v1189_v15 = vmax.f32 %v775_v9, 0.0  ;;  %v1188_v10 = vmax.f32 %v688_v21, 0.0  ;;  %v845_v16 = vpop.f32.mrb[16].mxu0 }
 0x1a1   :  { %v2032_v32 = vpack.c.bf16 %v1187_v14, %v1171_v22  ;;  %v1190_v26 = vmax.f32 %v777_v46, 0.0  ;;  %v934_v40 = vpop.f32.mrb[16].mxu1  ;;  %v847_v37 = vpop.f32.mrb[17].mxu0  ;;  %v846_v7 = vadd.f32 %v845_v16, %v2638_v57 }
 0x1a2   :  { %v2040_v36 = vpack.c.bf16 %v1189_v15, %v1173_v35  ;;  %v2030_v41 = vpack.c.bf16 %v1188_v10, %v1172_v48  ;;  %v936_v17 = vpop.f32.mrb[17].mxu1  ;;  %v935_v47 = vadd.f32 %v934_v40, %v2638_v57  ;;  %v848_v18 = vadd.f32 %v847_v37, %v2638_v57 }
 0x1a3   :  { %v2038_v34 = vpack.c.bf16 %v1190_v26, %v1174_v11  ;;  %v937_v20 = vadd.f32 %v936_v17, %v2638_v57  ;;  %v1143_v61 = vmax.f32 %v846_v7, 0.0 }
 0x1a4   :  { %v851_v33 = vpop.f32.mrb[18].mxu0  ;;  %2031 = vmatprep.subr.bf16.mxu0 %v2030_v41  ;;  %v1145_v1 = vmax.f32 %v935_v47, 0.0  ;;  %v1144_v13 = vmax.f32 %v848_v18, 0.0 }
 0x1a5   :  { %v852_v42 = vadd.f32 %v851_v33, %v2641_v58  ;;  %v940_v51 = vpop.f32.mrb[18].mxu1  ;;  %2039 = vmatprep.subr.bf16.mxu1 %v2038_v34  ;;  %v853_v53 = vpop.f32.mrb[19].mxu0  ;;  %2033 = vmatpush1.bf16.msra.mxu0 %v2032_v32  ;;  %v1146_v2 = vmax.f32 %v937_v20, 0.0 }
 0x1a6   :  { %v941_v59 = vadd.f32 %v940_v51, %v2641_v58  ;;  %v854_v28 = vadd.f32 %v853_v53, %v2641_v58  ;;  %v942_v19 = vpop.f32.mrb[19].mxu1  ;;  %2041 = vmatpush1.bf16.msra.mxu1 %v2040_v36 }
 0x1a7   :  { %v1159_v62 = vmax.f32 %v852_v42, 0.0  ;;  %v943_v12 = vadd.f32 %v942_v19, %v2641_v58 }
 0x1a8   :  { %v1161_v38 = vmax.f32 %v941_v59, 0.0  ;;  %v1160_v43 = vmax.f32 %v854_v28, 0.0  ;;  %v857_v39 = vpop.f32.mrb[20].mxu0  ;;  %1940 = vmatmul.mubr.msk.f32.vlgmr.msra.gmra.mrb[34].mxu0 %vm410_vm0, %v2670_v60 }
 0x1a9   :  { %v2044_v44 = vpack.c.bf16 %v1159_v62, %v1143_v61  ;;  %v1162_v29 = vmax.f32 %v943_v12, 0.0  ;;  %v946_v3 = vpop.f32.mrb[20].mxu1  ;;  %v859_v30 = vpop.f32.mrb[21].mxu0  ;;  %1941 = vmatmul.mubr.msk.f32.vlgmr.msra.gmra.mrb[34].mxu1 %vm410_vm0, %v2670_v60  ;;  %1552 = vmatprep.mubr.f32.mxu0 %v2777_v56  ;;  %v858_v49 = vadd.f32 %v857_v39, %v2650_v23 }
 0x1aa   :  { %v2052_v63 = vpack.c.bf16 %v1161_v38, %v1145_v1  ;;  %v2042_v31 = vpack.c.bf16 %v1160_v43, %v1144_v13  ;;  %v948_v45 = vpop.f32.mrb[21].mxu1  ;;  %1623 = vmatprep.mubr.f32.mxu1 %v2777_v56  ;;  %v947_v52 = vadd.f32 %v946_v3, %v2650_v23  ;;  %v860_v54 = vadd.f32 %v859_v30, %v2650_v23 }
 0x1ab   :  { %v2050_v24 = vpack.c.bf16 %v1162_v29, %v1146_v2  ;;  %v949_v4 = vadd.f32 %v948_v45, %v2650_v23  ;;  %v1175_v55 = vmax.f32 %v858_v49, 0.0 }
 0x1ac   :  { %v863_v6 = vpop.f32.mrb[22].mxu0  ;;  %2043 = vmatprep.subr.bf16.mxu0 %v2042_v31  ;;  %v1177_v46 = vmax.f32 %v947_v52, 0.0  ;;  %v1176_v35 = vmax.f32 %v860_v54, 0.0 }
 0x1ad   :  { %v864_v50 = vadd.f32 %v863_v6, %v2653_v25  ;;  %v952_v27 = vpop.f32.mrb[22].mxu1  ;;  %2051 = vmatprep.subr.bf16.mxu1 %v2050_v24  ;;  %v865_v5 = vpop.f32.mrb[23].mxu0  ;;  %2045 = vmatpush1.bf16.msra.mxu0 %v2044_v44  ;;  %v1178_v16 = vmax.f32 %v949_v4, 0.0 }
 0x1ae   :  { %v953_v8 = vadd.f32 %v952_v27, %v2653_v25  ;;  %v866_v9 = vadd.f32 %v865_v5, %v2653_v25  ;;  %v954_v21 = vpop.f32.mrb[23].mxu1  ;;  %2053 = vmatpush1.bf16.msra.mxu1 %v2052_v63 }
 0x1af   :  { %v1191_v22 = vmax.f32 %v864_v50, 0.0  ;;  %v955_v14 = vadd.f32 %v954_v21, %v2653_v25 }
 0x1b0   :  { %v1193_v48 = vmax.f32 %v953_v8, 0.0  ;;  %v1192_v15 = vmax.f32 %v866_v9, 0.0  ;;  %v1023_v10 = vpop.f32.mrb[24].mxu0 }
 0x1b1   :  { %v2048_v11 = vpack.c.bf16 %v1191_v22, %v1175_v55  ;;  %v1194_v32 = vmax.f32 %v955_v14, 0.0  ;;  %v1112_v26 = vpop.f32.mrb[24].mxu1  ;;  %v1025_v40 = vpop.f32.mrb[25].mxu0  ;;  %v1024_v34 = vadd.f32 %v1023_v10, %v2638_v57 }
 0x1b2   :  { %v2056_v37 = vpack.c.bf16 %v1193_v48, %v1177_v46  ;;  %v2046_v36 = vpack.c.bf16 %v1192_v15, %v1176_v35  ;;  %v1114_v41 = vpop.f32.mrb[25].mxu1  ;;  %v1113_v7 = vadd.f32 %v1112_v26, %v2638_v57  ;;  %v1026_v47 = vadd.f32 %v1025_v40, %v2638_v57 }
 0x1b3   :  { %v2054_v17 = vpack.c.bf16 %v1194_v32, %v1178_v16  ;;  %v1115_v33 = vadd.f32 %v1114_v41, %v2638_v57  ;;  %v1147_v19 = vmax.f32 %v1024_v34, 0.0 }
 0x1b4   :  { %v1029_v18 = vpop.f32.mrb[26].mxu0  ;;  %2047 = vmatprep.subr.bf16.mxu0 %v2046_v36  ;;  %v1149_v12 = vmax.f32 %v1113_v7, 0.0  ;;  %v1148_v1 = vmax.f32 %v1026_v47, 0.0 }
 0x1b5   :  { %v1030_v20 = vadd.f32 %v1029_v18, %v2641_v58  ;;  %v1118_v42 = vpop.f32.mrb[26].mxu1  ;;  %2055 = vmatprep.subr.bf16.mxu1 %v2054_v17  ;;  %v1031_v51 = vpop.f32.mrb[27].mxu0  ;;  %2049 = vmatpush1.bf16.msra.mxu0 %v2048_v11  ;;  %v1150_v43 = vmax.f32 %v1115_v33, 0.0  ;;  %v1200_v11 = vstv %s1905_s7 }
 0x1b6   :  { %v1119_v53 = vadd.f32 %v1118_v42, %v2641_v58  ;;  %v1032_v59 = vadd.f32 %v1031_v51, %v2641_v58  ;;  %v1120_v28 = vpop.f32.mrb[27].mxu1  ;;  %2057 = vmatpush1.bf16.msra.mxu1 %v2056_v37 }
 0x1b7   :  { %v1163_v61 = vmax.f32 %v1030_v20, 0.0  ;;  %v1121_v62 = vadd.f32 %v1120_v28, %v2641_v58 }
 0x1b8   :  { %v1165_v13 = vmax.f32 %v1119_v53, 0.0  ;;  %v1164_v57 = vmax.f32 %v1032_v59, 0.0  ;;  %v1035_v38 = vpop.f32.mrb[28].mxu0  ;;  %1942 = vmatmul.mubr.msk.f32.vlgmr.msra.gmra.mrb[36].mxu0 %vm410_vm0, %v2670_v60 }
 0x1b9   :  { %v2060_v39 = vpack.c.bf16 %v1163_v61, %v1147_v19  ;;  %v1166_v2 = vmax.f32 %v1121_v62, 0.0  ;;  %v1124_v44 = vpop.f32.mrb[28].mxu1  ;;  %v1037_v29 = vpop.f32.mrb[29].mxu0  ;;  %1943 = vmatmul.mubr.msk.f32.vlgmr.msra.gmra.mrb[36].mxu1 %vm410_vm0, %v2670_v60  ;;  %1694 = vmatprep.mubr.f32.mxu0 %v2777_v56  ;;  %v1036_v31 = vadd.f32 %v1035_v38, %v2650_v23 }
 0x1ba   :  { %v2068_v3 = vpack.c.bf16 %v1165_v13, %v1149_v12  ;;  %v2058_v58 = vpack.c.bf16 %v1164_v57, %v1148_v1  ;;  %v1126_v30 = vpop.f32.mrb[29].mxu1  ;;  %1765 = vmatprep.mubr.f32.mxu1 %v2777_v56  ;;  %v1125_v45 = vadd.f32 %v1124_v44, %v2650_v23  ;;  %v1038_v24 = vadd.f32 %v1037_v29, %v2650_v23 }
 0x1bb   :  { %v2066_v63 = vpack.c.bf16 %v1166_v2, %v1150_v43  ;;  %v1127_v52 = vadd.f32 %v1126_v30, %v2650_v23  ;;  %v1179_v5 = vmax.f32 %v1036_v31, 0.0 }
 0x1bc   :  { %v1041_v49 = vpop.f32.mrb[30].mxu0  ;;  %2059 = vmatprep.subr.bf16.mxu0 %v2058_v58  ;;  %v1181_v21 = vmax.f32 %v1125_v45, 0.0  ;;  %v1180_v55 = vmax.f32 %v1038_v24, 0.0 }
 0x1bd   :  { %v1042_v54 = vadd.f32 %v1041_v49, %v2653_v25  ;;  %v1130_v6 = vpop.f32.mrb[30].mxu1  ;;  %2067 = vmatprep.subr.bf16.mxu1 %v2066_v63  ;;  %v1043_v4 = vpop.f32.mrb[31].mxu0  ;;  %2061 = vmatpush1.bf16.msra.mxu0 %v2060_v39  ;;  %v1182_v14 = vmax.f32 %v1127_v52, 0.0 }
 0x1be   :  { %v1131_v50 = vadd.f32 %v1130_v6, %v2653_v25  ;;  %v1044_v56 = vadd.f32 %v1043_v4, %v2653_v25  ;;  %v1132_v27 = vpop.f32.mrb[31].mxu1  ;;  %2069 = vmatpush1.bf16.msra.mxu1 %v2068_v3 }
 0x1bf   :  { %v1195_v8 = vmax.f32 %v1042_v54, 0.0  ;;  %v1133_v9 = vadd.f32 %v1132_v27, %v2653_v25  ;;  %v2122_v25 = vmov 1966171168  }
 0x1c0   :  { %v1197_v22 = vmax.f32 %v1131_v50, 0.0  ;;  %v1196_v23 = vmax.f32 %v1044_v56, 0.0  ;;  %v1793_v16 = vunpack.c.l.s4 %v2122_v25 }
 0x1c1   :  { %v2064_v46 = vpack.c.bf16 %v1195_v8, %v1179_v5  ;;  %v1198_v35 = vmax.f32 %v1133_v9, 0.0 }
 0x1c2   :  { %v2072_v48 = vpack.c.bf16 %v1197_v22, %v1181_v21  ;;  %v2062_v15 = vpack.c.bf16 %v1196_v23, %v1180_v55  ;;  %v1794_v32 = vunpack.c.0.s8 %v1793_v16 }
 0x1c3   :  { %v2070_v10 = vpack.c.bf16 %v1198_v35, %v1182_v14 }
 0x1c4   :  { %2063 = vmatprep.subr.bf16.mxu0 %v2062_v15  ;;  %v1797_v34 = vsub.s32 %v1794_v32, %v2779_v0 }
 0x1c5   :  { %2071 = vmatprep.subr.bf16.mxu1 %v2070_v10  ;;  %2065 = vmatpush1.bf16.msra.mxu0 %v2064_v46 }
 0x1c6   :  { %2073 = vmatpush1.bf16.msra.mxu1 %v2072_v48 }
 0x1c8   :  { %1944 = vmatmul.mubr.msk.f32.vlgmr.msra.gmra.mrb[38].mxu0 %vm410_vm0, %v2670_v60 }
 0x1c9   :  { %1945 = vmatmul.mubr.msk.f32.vlgmr.msra.gmra.mrb[38].mxu1 %vm410_vm0, %v2670_v60 }
 0x26b   :  { %v1270_v26 = vpop.f32.mrb[32].mxu0 }
 0x26c   :  { %v1271_v40 = vadd.f32 %v1270_v26, %v1200_v11  ;;  %v1341_v37 = vpop.f32.mrb[32].mxu1  ;;  %v1272_v36 = vpop.f32.mrb[33].mxu0 }
 0x26d   :  { %v1342_v41 = vadd.f32 %v1341_v37, %v1200_v11  ;;  %v1273_v17 = vadd.f32 %v1272_v36, %v1200_v11  ;;  %v1343_v7 = vpop.f32.mrb[33].mxu1 }
 0x26e   :  { %v1344_v47 = vadd.f32 %v1343_v7, %v1200_v11 }
 0x26f   :  { %v1788_v18 = vcombine.low %v1271_v40, %v1273_v17 }
 0x270   :  { %v1789_v33 = vcombine.low %v1342_v41, %v1344_v47 }
 0x271   :  { %v1798_v20 = vrot.slane %v1788_v18, %v1797_v34 }
 0x272   :  { %v1805_v42 = vrot.slane %v1789_v33, %v1797_v34 }
 0x274   :  { %v1820_v60 = vcombine.low %v1798_v20, %v1805_v42 }
 0x276   :  { %v1828_v43 = vrot.slane %v1820_v60, %v1797_v34 }
 0x27b   :  { %v1412_v51 = vpop.f32.mrb[34].mxu0 }
 0x27c   :  { %v1413_v53 = vadd.f32 %v1412_v51, %v1200_v11  ;;  %v1483_v59 = vpop.f32.mrb[34].mxu1  ;;  %v1414_v28 = vpop.f32.mrb[35].mxu0 }
 0x27d   :  { %v1484_v19 = vadd.f32 %v1483_v59, %v1200_v11  ;;  %v1415_v61 = vadd.f32 %v1414_v28, %v1200_v11  ;;  %v1485_v62 = vpop.f32.mrb[35].mxu1 }
 0x27e   :  { %v1486_v12 = vadd.f32 %v1485_v62, %v1200_v11 }
 0x27f   :  { %v1790_v1 = vcombine.low %v1413_v53, %v1415_v61 }
 0x280   :  { %v1791_v13 = vcombine.low %v1484_v19, %v1486_v12 }
 0x281   :  { %v1812_v57 = vrot.slane %v1790_v1, %v1797_v34 }
 0x282   :  { %v1819_v38 = vrot.slane %v1791_v13, %v1797_v34 }
 0x284   :  { %v1821_v0 = vcombine.low %v1812_v57, %v1819_v38 }
 0x286   :  { %v1835_v39 = vrot.slane %v1821_v0, %v1797_v34 }
 0x288   :  { %v1836_v2 = vcombine.low %v1828_v43, %v1835_v39 }
 0x28a   :  { %1888 = vst [vmem:[#allocation5] sm:$0xff] %v1836_v2 }
 0x28b   :  { %v1554_v44 = vpop.f32.mrb[36].mxu0 }
 0x28c   :  { %v1555_v29 = vadd.f32 %v1554_v44, %v1200_v11  ;;  %v1625_v3 = vpop.f32.mrb[36].mxu1  ;;  %v1556_v58 = vpop.f32.mrb[37].mxu0 }
 0x28d   :  { %v1626_v30 = vadd.f32 %v1625_v3, %v1200_v11  ;;  %v1557_v63 = vadd.f32 %v1556_v58, %v1200_v11  ;;  %v1627_v31 = vpop.f32.mrb[37].mxu1 }
 0x28e   :  { %v1628_v45 = vadd.f32 %v1627_v31, %v1200_v11 }
 0x28f   :  { %v1837_v24 = vcombine.low %v1555_v29, %v1557_v63 }
 0x290   :  { %v1838_v49 = vcombine.low %v1626_v30, %v1628_v45 }
 0x291   :  { %v1847_v52 = vrot.slane %v1837_v24, %v1797_v34 }
 0x292   :  { %v1854_v54 = vrot.slane %v1838_v49, %v1797_v34 }
 0x294   :  { %v1869_v6 = vcombine.low %v1847_v52, %v1854_v54 }
 0x296   :  { %v1877_v35 = vrot.slane %v1869_v6, %v1797_v34 }
 0x29b   :  { %v1696_v4 = vpop.f32.mrb[38].mxu0 }
 0x29c   :  { %v1697_v50 = vadd.f32 %v1696_v4, %v1200_v11  ;;  %v1767_v56 = vpop.f32.mrb[38].mxu1  ;;  %v1698_v27 = vpop.f32.mrb[39].mxu0 }
 0x29d   :  { %v1768_v5 = vadd.f32 %v1767_v56, %v1200_v11  ;;  %v1699_v8 = vadd.f32 %v1698_v27, %v1200_v11  ;;  %v1769_v9 = vpop.f32.mrb[39].mxu1 }
 0x29e   :  { %v1770_v21 = vadd.f32 %v1769_v9, %v1200_v11 }
 0x29f   :  { %v1839_v55 = vcombine.low %v1697_v50, %v1699_v8 }
 0x2a0   :  { %v1840_v22 = vcombine.low %v1768_v5, %v1770_v21 }
 0x2a1   :  { %v1861_v23 = vrot.slane %v1839_v55, %v1797_v34 }
 0x2a2   :  { %v1868_v14 = vrot.slane %v1840_v22, %v1797_v34 }
 0x2a4   :  { %v1870_v46 = vcombine.low %v1861_v23, %v1868_v14 }
 0x2a6   :  { %v1884_v48 = vrot.slane %v1870_v46, %v1797_v34 }
 0x2a8   :  { %v1885_v15 = vcombine.low %v1877_v35, %v1884_v48 }
 0x2aa   :  { %1889 = vst [vmem:[#allocation5 + $0x8] sm:$0xff] %v1885_v15 }
 0x2ab   :  { %2104 = shalt.err (!%p2101_p9)
}
 0x2ac   :  { %s2105_s2 = scalar_lea.hbm %s2758_s8, 256 }
 0x2ad   :  { %p2106_p10 = scmp.ne.s32.totalorder %s2758_s8, %s2105_s2  ;;  %p2109_p11 = scmp.lt.u32.totalorder %s2105_s2, %s2758_s8 }
 0x2af   :  { %p2111_p12 = pnand %p2109_p11, %p2106_p10 }
 0x2b1   :  { %2114 = shalt.err (!%p2111_p12)
}
 0x2b2   :  { %1899 = dma.vmem_to_hbm [thread:$0]  %s1897_s28, 256, %s2758_s8, [#allocation3]  }
 0x2b3   :  { %2117 = dma.done.wait [#allocation3], 256  }
 0x2b4   :  { %2118 = vsyncadd [#allocation3], 4294967040 }
 0x2b5   :  { %1903 = vsyncpa [#allocation3], 1 }
 0x2b6   :  { %1904 = vsyncpa [#allocation4], 1 }

</bundles_post_ra>
